<compile_context>
chip_gen: v5e
topology: v5e:2x2
jax: 0.10.0
libtpu: 0.0.40
codegen_flags: <defaults>
</compile_context>

<pallas_src>
import functools

import numpy as np

import jax
import jax.numpy as jnp
from jax.experimental import pallas as pl
from jax.experimental.pallas import tpu as pltpu


def _label_smoothing_kernel(x_ref, tgt_ref, loss_ref, *, confidence, smoothing):
    x = x_ref[...].astype(jnp.float32)                       # (tn, C) f32 math
    tgt = tgt_ref[...]                                       # (tn, 1) int32

    # numerically-stable pieces of log_softmax, without materializing logprobs
    m = jnp.max(x, axis=-1, keepdims=True)                   # (tn, 1)
    shifted = x - m                                          # (tn, C)
    lse = jnp.log(jnp.sum(jnp.exp(shifted), axis=-1, keepdims=True))  # (tn, 1)

    # one-hot pick of shifted[row, tgt[row]] (no dynamic gather on TPU);
    # the lane-iota compare is fused into the select, no extra tile kept live.
    cls = jax.lax.broadcasted_iota(jnp.int32, shifted.shape, 1)
    picked = jnp.sum(jnp.where(cls == tgt, shifted, 0.0),
                     axis=-1, keepdims=True)                 # (tn, 1)
    sum_shifted = jnp.sum(shifted, axis=-1, keepdims=True)   # (tn, 1)

    inv_c = 1.0 / shifted.shape[-1]
    nll = lse - picked                                       # -logprobs[tgt]
    smooth = lse - sum_shifted * inv_c                       # -mean(logprobs)
    loss_ref[...] = confidence * nll + smoothing * smooth    # (tn, 1)


def _sublane_multiple(dtype):
    itemsize = np.dtype(dtype).itemsize
    return max(8, 8 * (4 // max(1, itemsize)))   # 8 for f32, 16 for bf16, 32 for int8


def _choose_tile_n(N, C, dtype, max_tile_bytes=4 << 20):
    """Largest row tile (multiple of the sublane packing) dividing N with an
    f32 working tile <= max_tile_bytes."""
    sub = _sublane_multiple(dtype)
    cap = max(sub, (max_tile_bytes // (C * 4)) // sub * sub)
    if N <= cap:
        return N                      # full-extent block is always legal
    t = cap
    while t >= sub:
        if N % t == 0:
            return t
        t -= sub
    # TODO(synk): pad N up to a sublane multiple instead of falling back to a
    # single huge block when N has no friendly divisor.
    return N


def label_smoothing_loss(x, target, smoothing=0.1, tile_n=None):
    """x: (N, C) logits (f32/bf16/...), target: (N,) integer labels.
    Returns scalar mean label-smoothed NLL loss (float32)."""
    N, C = x.shape
    confidence = 1.0 - smoothing
    if tile_n is None:
        tile_n = _choose_tile_n(N, C, x.dtype)
    assert N % tile_n == 0, (N, tile_n)
    assert tile_n == N or tile_n % _sublane_multiple(x.dtype) == 0, tile_n

    tgt = target.astype(jnp.int32).reshape(N, 1)
    kernel = functools.partial(_label_smoothing_kernel,
                               confidence=confidence, smoothing=smoothing)

    per_row = pl.pallas_call(
        kernel,
        out_shape=jax.ShapeDtypeStruct((N, 1), jnp.float32),
        grid=(N // tile_n,),
        in_specs=[
            pl.BlockSpec((tile_n, C), lambda i: (i, 0)),
            pl.BlockSpec((tile_n, 1), lambda i: (i, 0)),
        ],
        out_specs=pl.BlockSpec((tile_n, 1), lambda i: (i, 0)),
        compiler_params=pltpu.CompilerParams(
            dimension_semantics=("parallel",),
            vmem_limit_bytes=32 * 1024 * 1024,
        ),
    )(x, tgt)

    # Final mean over the batch: tiny, precise, and keeps the grid axis fully
    # parallel (no serial accumulator inside the kernel).
    return jnp.mean(per_row)


def _reference(x, target, smoothing):
    confidence = 1.0 - smoothing
    logprobs = jax.nn.log_softmax(x.astype(jnp.float32), axis=-1)
    nll = -jnp.take_along_axis(logprobs, target[:, None], axis=-1)[:, 0]
    smooth = -jnp.mean(logprobs, axis=-1)
    return jnp.mean(confidence * nll + smoothing * smooth)


if __name__ == "__main__":
    key = jax.random.PRNGKey(0)
    kx, kt = jax.random.split(key)
    N, C = 8, 32
    smoothing = 0.1

    x = jax.random.normal(kx, (N, C), dtype=jnp.float32)
    target = jax.random.randint(kt, (N,), 0, C, dtype=jnp.int32)

    loss = jax.block_until_ready(label_smoothing_loss(x, target, smoothing=smoothing))
    ref = _reference(x, target, smoothing)
    assert jnp.allclose(loss, ref, atol=1e-5, rtol=1e-5), (loss, ref)

    # bf16 streaming path (math still f32 in-kernel) — halves HBM bytes.
    loss_bf16 = jax.block_until_ready(
        label_smoothing_loss(x.astype(jnp.bfloat16), target, smoothing=smoothing))
    assert jnp.allclose(loss_bf16, ref, atol=5e-2, rtol=5e-2), (loss_bf16, ref)

    print("KERNEL_OK")
</pallas_src>

<mosaic_0001>
module attributes {stable_mosaic.version = 11 : i64} {
  func.func @_label_smoothing_kernel(%arg0: i32, %arg1: memref<8x32xf32, #tpu.memory_space<vmem>>, %arg2: memref<8x1xi32, #tpu.memory_space<vmem>>, %arg3: memref<8x1xf32, #tpu.memory_space<vmem>>) attributes {dimension_semantics = [#tpu.dimension_semantics<parallel>], iteration_bounds = array<i64: 1>, scalar_prefetch = 0 : i64, scratch_operands = 0 : i64, tpu.core_type = #tpu.core_type<tc>, window_params = [{transform_indices = @transform_0, window_bounds = array<i64: 8, 32>}, {transform_indices = @transform_1, window_bounds = array<i64: 8, 1>}, {transform_indices = @transform_2, window_bounds = array<i64: 8, 1>}]} {
    %c0 = arith.constant 0 : index
    %c0_0 = arith.constant 0 : index
    %0 = vector.load %arg1[%c0, %c0_0] : memref<8x32xf32, #tpu.memory_space<vmem>>, vector<8x32xf32>
    %c0_1 = arith.constant 0 : index
    %c0_2 = arith.constant 0 : index
    %1 = vector.load %arg2[%c0_1, %c0_2] : memref<8x1xi32, #tpu.memory_space<vmem>>, vector<8x1xi32>
    %cst = arith.constant dense<0xFF800000> : vector<8xf32>
    %2 = vector.multi_reduction <maximumf>, %0, %cst [1] : vector<8x32xf32> to vector<8xf32>
    %3 = vector.shape_cast %2 : vector<8xf32> to vector<8x1xf32>
    %4 = vector.broadcast %3 : vector<8x1xf32> to vector<8x32xf32>
    %5 = arith.subf %0, %4 : vector<8x32xf32>
    %6 = math.exp %5 : vector<8x32xf32>
    %cst_3 = arith.constant dense<0.000000e+00> : vector<8xf32>
    %7 = vector.multi_reduction <add>, %6, %cst_3 [1] : vector<8x32xf32> to vector<8xf32>
    %8 = vector.shape_cast %7 : vector<8xf32> to vector<8x1xf32>
    %9 = math.log %8 : vector<8x1xf32>
    %10 = tpu.iota {dimensions = array<i32: 1>} : vector<8x32xi32>
    %11 = vector.broadcast %1 : vector<8x1xi32> to vector<8x32xi32>
    %12 = arith.cmpi eq, %10, %11 : vector<8x32xi32>
    %cst_4 = arith.constant 0.000000e+00 : f32
    %13 = vector.broadcast %cst_4 : f32 to vector<8x32xf32>
    %14 = arith.select %12, %5, %13 : vector<8x32xi1>, vector<8x32xf32>
    %cst_5 = arith.constant dense<0.000000e+00> : vector<8xf32>
    %15 = vector.multi_reduction <add>, %14, %cst_5 [1] : vector<8x32xf32> to vector<8xf32>
    %16 = vector.shape_cast %15 : vector<8xf32> to vector<8x1xf32>
    %cst_6 = arith.constant dense<0.000000e+00> : vector<8xf32>
    %17 = vector.multi_reduction <add>, %5, %cst_6 [1] : vector<8x32xf32> to vector<8xf32>
    %18 = vector.shape_cast %17 : vector<8xf32> to vector<8x1xf32>
    %19 = arith.subf %9, %16 : vector<8x1xf32>
    %cst_7 = arith.constant 3.125000e-02 : f32
    %20 = vector.broadcast %cst_7 : f32 to vector<8x1xf32>
    %21 = arith.mulf %18, %20 : vector<8x1xf32>
    %22 = arith.subf %9, %21 : vector<8x1xf32>
    %cst_8 = arith.constant 0.899999976 : f32
    %23 = vector.broadcast %cst_8 : f32 to vector<8x1xf32>
    %24 = arith.mulf %23, %19 : vector<8x1xf32>
    %cst_9 = arith.constant 1.000000e-01 : f32
    %25 = vector.broadcast %cst_9 : f32 to vector<8x1xf32>
    %26 = arith.mulf %25, %22 : vector<8x1xf32>
    %27 = arith.addf %24, %26 : vector<8x1xf32>
    %c0_10 = arith.constant 0 : index
    %c0_11 = arith.constant 0 : index
    %28 = vector.load %arg3[%c0_10, %c0_11] : memref<8x1xf32, #tpu.memory_space<vmem>>, vector<8x1xf32>
    tpu.vector_store %arg3[%c0_10, %c0_11], %27 {strides = array<i32>} : memref<8x1xf32, #tpu.memory_space<vmem>>, vector<8x1xf32>,
    return
  }
  func.func @transform_0(%arg0: i32) -> (i32, i32) {
    %c0_i32 = arith.constant 0 : i32
    %c0_i32_0 = arith.constant 0 : i32
    return %arg0, %c0_i32 : i32, i32
  }
  func.func @transform_1(%arg0: i32) -> (i32, i32) {
    %c0_i32 = arith.constant 0 : i32
    %c0_i32_0 = arith.constant 0 : i32
    return %arg0, %c0_i32 : i32, i32
  }
  func.func @transform_2(%arg0: i32) -> (i32, i32) {
    %c0_i32 = arith.constant 0 : i32
    %c0_i32_0 = arith.constant 0 : i32
    return %arg0, %c0_i32 : i32, i32
  }
}

</mosaic_0001>

<bundles_post_ra>
// kernel: tpu_custom_call.1
= control target key start
LH: loop header
LB: loop body
LE: loop exit
PB: predicated region body
PF: predicated region fallthrough
CT: control target
= control target key end

     0   :  { %vm13_vm0 = vcmask 261120   ;;  %v56_v1 = vmov 0   ;;  %v25_v9 = vlaneseq  ;;  %vm44_vm2 = vcmask 7168   ;;  %s85_s0 = inlined_call_operand.vmem [shape: f32[8,32], index: 0, kind: input, shape index: {}]   ;;  %s86_s1 = inlined_call_operand.vmem [shape: s32[8,1], index: 1, kind: input, shape index: {}]   ;;  %s87_s2 = inlined_call_operand.vmem [shape: f32[8,1], index: 2, kind: output, shape index: {}]  }
   0x1   :  { %v11_v0 = vld [vmem:[%s85_s0] sm:$0xff]  ;;  %51 = vset.pattern.permute.xlu0 %v56_v1 }
   0x2   :  { %v14_v2 = vsel %vm13_vm0, %v11_v0, -inf  ;;  %v12_v3 = vld [vmem:[%s86_s1] sm:$0xff]  ;;  %v26_v10 = vand.u32 127, %v25_v9 }
   0x3   :  { %15 = vmax.xlane.f32.xlu0 %v14_v2 }
  0x17   :  { %28 = vperm.xlu0 %51, %v12_v3  }
  0x76   :  { %v16_v4 = vpop.xlane.xlu0 %15 }
  0x77   :  { %v17_v5 = vsub.f32 %v11_v0, %v16_v4 }
  0x79   :  { %v18_v6 = vmul.f32 1.442695, %v17_v5  ;;  %v35_v12 = vsel %vm13_vm0, %v17_v5, 0.0 }
  0x7b   :  { %52 = vpow2.f32 %v18_v6 }
  0x81   :  { %v53_v7 = vpop.eup %52 }
  0x82   :  { %v20_v8 = vsel %vm13_vm0, %v53_v7, 0.0 }
  0x83   :  { %21 = vadd.xlane.f32.xlu1 %v20_v8 }
  0x89   :  { %v29_v11 = vpop.permute.xlu0 %28 }
  0x8a   :  { %vm30_vm1 = vcmp.eq.s32.totalorder %v26_v10, %v29_v11 }
  0x8b   :  { %36 = vadd.xlane.f32.xlu1 %v35_v12  ;;  %v31_v13 = vsel %vm30_vm1, %v17_v5, 0.0 }
  0x8c   :  { %v32_v14 = vsel %vm13_vm0, %v31_v13, 0.0 }
  0x8d   :  { %33 = vadd.xlane.f32.xlu2 %v32_v14 }
  0xf6   :  { %v22_v15 = vpop.xlane.xlu1 %21 }
  0xf7   :  { %54 = vlog2.f32 %v22_v15 }
  0xfd   :  { %v55_v16 = vpop.eup %54 }
  0xfe   :  { %v24_v17 = vmul.f32 0.6931472, %v55_v16  ;;  %v37_v18 = vpop.xlane.xlu1 %36 }
  0xff   :  { %v39_v19 = vmul.f32 0.03125, %v37_v18 }
 0x100   :  { %v34_v20 = vpop.xlane.xlu2 %33 }
 0x101   :  { %v40_v21 = vsub.f32 %v24_v17, %v39_v19  ;;  %v38_v22 = vsub.f32 %v24_v17, %v34_v20 }
 0x103   :  { %v42_v23 = vmul.f32 0.1, %v40_v21  ;;  %v41_v24 = vmul.f32 0.9, %v38_v22 }
 0x105   :  { %v43_v25 = vadd.f32 %v42_v23, %v41_v24 }
 0x107   :  { %45 = vst.msk [vmem:[%s87_s2] sm:$0xff] %vm44_vm2, %v43_v25 }

</bundles_post_ra>
